<compile_context>
chip_gen: v5e
topology: v5e:2x2
jax: 0.10.0
libtpu: 0.0.40
codegen_flags: <defaults>
</compile_context>

<pallas_src>
import functools

import jax
import jax.numpy as jnp
from jax import lax
from jax.experimental import pallas as pl
from jax.experimental.pallas import tpu as pltpu

KH = KW = 4
PAD = 1
BN_EPS = 1e-5
LEAKY_SLOPE = 0.2
LANE = 128


def _round_up(x, m):
    return (x + m - 1) // m * m


# ------------------- sweep 1: conv (im2col matmul) + channel stats -------------------

def _conv_stats_kernel(p_ref, w_ref, y_ref, sum_ref, sq_ref):
    # p_ref: [TM, K] bf16   w_ref: [K, Cp] bf16
    # y_ref: [TM, Cp] f32   sum_ref / sq_ref: [1, Cp] f32 accumulators (grid-resident)
    @pl.when(pl.program_id(0) == 0)
    def _init():
        sum_ref[...] = jnp.zeros_like(sum_ref)
        sq_ref[...] = jnp.zeros_like(sq_ref)

    y = jnp.dot(p_ref[...], w_ref[...], preferred_element_type=jnp.float32)
    y_ref[...] = y
    sum_ref[...] += jnp.sum(y, axis=0, keepdims=True)
    sq_ref[...] += jnp.sum(y * y, axis=0, keepdims=True)


# ------------------- sweep 2: folded BatchNorm (one FMA) + LeakyReLU -------------------

def _bn_act_kernel(y_ref, a_ref, b_ref, o_ref):
    z = y_ref[...] * a_ref[...] + b_ref[...]
    o_ref[...] = jnp.where(z >= 0.0, z, LEAKY_SLOPE * z)


# ------------------------------------ wrapper ------------------------------------

def _im2col_reflect(x, stride, compute_dtype):
    """x: [N, Cin, H, W] -> patches [N*Ho*Wo, Cin*KH*KW] (ci-major, kh, kw order)."""
    n, cin, h, w = x.shape
    xp = jnp.pad(x.astype(compute_dtype),
                 ((0, 0), (0, 0), (PAD, PAD), (PAD, PAD)), mode="reflect")
    ho = (h + 2 * PAD - KH) // stride + 1
    wo = (w + 2 * PAD - KW) // stride + 1
    taps = []
    for kh in range(KH):
        for kw in range(KW):
            taps.append(
                xp[:, :, kh:kh + stride * ho:stride, kw:kw + stride * wo:stride])
    # [KH*KW, N, Cin, Ho, Wo] -> [N, Ho, Wo, Cin, KH*KW]  (matches OIHW weight flatten)
    pat = jnp.stack(taps, axis=0).transpose(1, 3, 4, 2, 0)
    return pat.reshape(n * ho * wo, cin * KH * KW), ho, wo


def _pick_tile_m(m, k, cout_pad, budget_bytes=12 * 1024 * 1024):
    """Tile rows so double-buffered bf16 patches + f32 y stay well under scoped VMEM
    (budget sized for v7x's 64 MiB physical VMEM; larger VMEM chips just pipeline more)."""
    per_row = 2 * (k * 2 + cout_pad * 4)          # 2x = double buffering
    tm = int(max(8, min(2048, budget_bytes // per_row)))
    tm = (tm // 8) * 8                            # sublane granularity
    tm = min(tm, _round_up(m, 8))
    return tm


def disblock_forward(x, conv_w, bn_gamma, bn_beta, *, stride,
                     compute_dtype=jnp.bfloat16, tile_m=None):
    """x: [N, Cin, H, W], conv_w: [Cout, Cin, 4, 4] -> [N, Cout, Ho, Wo] (NCHW)."""
    n, cin, h, w = x.shape
    cout = conv_w.shape[0]
    cout_pad = _round_up(cout, LANE)

    # TODO(synk): replace the wrapper-side im2col (KH*KW=16x input expansion in HBM) with
    # in-kernel patch construction from a halo'd NHWC block (pl.ANY + make_async_copy);
    # bf16 patches already halve the expanded traffic.
    patches, ho, wo = _im2col_reflect(x, stride, compute_dtype)
    m, k = patches.shape

    tm = tile_m if tile_m is not None else _pick_tile_m(m, k, cout_pad)
    m_pad = _round_up(m, tm)
    if m_pad != m:
        patches = jnp.pad(patches, ((0, m_pad - m), (0, 0)))   # zero rows: stats-neutral
    n_tiles = m_pad // tm

    # weights: [Cout, Cin*16] -> [K, Cout_pad]; zero-padded channels -> lane-dense stores
    w_mat = conv_w.reshape(cout, cin * KH * KW).T.astype(compute_dtype)
    w_mat = jnp.pad(w_mat, ((0, 0), (0, cout_pad - cout)))

    vmem_limit = 64 * 1024 * 1024
    itemsize = jnp.dtype(compute_dtype).itemsize

    # ---- sweep 1: matmul + per-channel sum / sumsq ----
    y_full, ch_sum, ch_sq = pl.pallas_call(
        _conv_stats_kernel,
        grid=(n_tiles,),
        in_specs=[
            pl.BlockSpec((tm, k), lambda i: (i, 0)),
            pl.BlockSpec((k, cout_pad), lambda i: (0, 0)),
        ],
        out_specs=(
            pl.BlockSpec((tm, cout_pad), lambda i: (i, 0)),
            pl.BlockSpec((1, cout_pad), lambda i: (0, 0)),
            pl.BlockSpec((1, cout_pad), lambda i: (0, 0)),
        ),
        out_shape=(
            jax.ShapeDtypeStruct((m_pad, cout_pad), jnp.float32),
            jax.ShapeDtypeStruct((1, cout_pad), jnp.float32),
            jax.ShapeDtypeStruct((1, cout_pad), jnp.float32),
        ),
        compiler_params=pltpu.CompilerParams(
            dimension_semantics=("arbitrary",),
            vmem_limit_bytes=vmem_limit,
        ),
        cost_estimate=pl.CostEstimate(
            flops=2 * m_pad * k * cout_pad,
            transcendentals=0,
            bytes_accessed=(m_pad * k * itemsize + k * cout_pad * itemsize
                            + m_pad * cout_pad * 4 + 2 * cout_pad * 4),
        ),
    )(patches, w_mat)

    # ---- BN finalize (tiny [1, Cout_pad] vectors, f32): fold into z = y*a + b ----
    mean = ch_sum / float(m)
    var = jnp.maximum(ch_sq / float(m) - mean * mean, 0.0)       # biased, training-mode BN
    gamma = jnp.pad(bn_gamma.astype(jnp.float32).reshape(1, cout),
                    ((0, 0), (0, cout_pad - cout)))
    beta = jnp.pad(bn_beta.astype(jnp.float32).reshape(1, cout),
                   ((0, 0), (0, cout_pad - cout)))
    a = gamma * lax.rsqrt(var + BN_EPS)
    b = beta - mean * a

    # ---- sweep 2: in-place affine + LeakyReLU over y tiles ----
    z = pl.pallas_call(
        _bn_act_kernel,
        grid=(n_tiles,),
        in_specs=[
            pl.BlockSpec((tm, cout_pad), lambda i: (i, 0)),
            pl.BlockSpec((1, cout_pad), lambda i: (0, 0)),
            pl.BlockSpec((1, cout_pad), lambda i: (0, 0)),
        ],
        out_specs=pl.BlockSpec((tm, cout_pad), lambda i: (i, 0)),
        out_shape=jax.ShapeDtypeStruct((m_pad, cout_pad), jnp.float32),
        input_output_aliases={0: 0},
        compiler_params=pltpu.CompilerParams(
            dimension_semantics=("parallel",),
            vmem_limit_bytes=vmem_limit,
        ),
        cost_estimate=pl.CostEstimate(
            flops=3 * m_pad * cout_pad,
            transcendentals=0,
            bytes_accessed=2 * m_pad * cout_pad * 4,
        ),
    )(y_full, a, b)

    # slice padding off; slice + reshape + transpose fuse into one XLA copy (NCHW out).
    out = z[:m, :cout].reshape(n, ho, wo, cout).transpose(0, 3, 1, 2)
    return out.astype(x.dtype)


# ------------------------------------ reference ------------------------------------

def _reference(x, conv_w, bn_gamma, bn_beta, *, stride, conv_dtype=jnp.float32):
    """Pure-JAX reference of the PyTorch forward (training-mode BN)."""
    xp = jnp.pad(x.astype(conv_dtype),
                 ((0, 0), (0, 0), (PAD, PAD), (PAD, PAD)), mode="reflect")
    y = lax.conv_general_dilated(
        xp, conv_w.astype(conv_dtype),
        window_strides=(stride, stride), padding="VALID",
        dimension_numbers=("NCHW", "OIHW", "NCHW"),
        preferred_element_type=jnp.float32)
    mean = jnp.mean(y, axis=(0, 2, 3), keepdims=True)
    var = jnp.mean((y - mean) ** 2, axis=(0, 2, 3), keepdims=True)
    yh = (y - mean) * lax.rsqrt(var + BN_EPS)
    z = (yh * bn_gamma.astype(jnp.float32).reshape(1, -1, 1, 1)
         + bn_beta.astype(jnp.float32).reshape(1, -1, 1, 1))
    return jnp.where(z >= 0, z, LEAKY_SLOPE * z)


if __name__ == "__main__":
    # Small shapes: N=2, Cin=4, H=W=16, Cout=8, stride=2 -> out [2, 8, 8, 8]
    N, CIN, H, W = 2, 4, 16, 16
    COUT, STRIDE = 8, 2

    key = jax.random.PRNGKey(0)
    kx, kw = jax.random.split(key)
    x = jax.random.normal(kx, (N, CIN, H, W), dtype=jnp.float32)
    conv_w = 0.1 * jax.random.normal(kw, (COUT, CIN, KH, KW), dtype=jnp.float32)
    bn_gamma = jnp.ones((COUT,), dtype=jnp.float32)   # BatchNorm2d default weight
    bn_beta = jnp.zeros((COUT,), dtype=jnp.float32)   # BatchNorm2d default bias

    fwd = jax.jit(functools.partial(disblock_forward, stride=STRIDE))
    out = jax.block_until_ready(fwd(x, conv_w, bn_gamma, bn_beta))
    assert out.shape == (N, COUT, H // STRIDE, W // STRIDE), out.shape

    # tight check: same bf16 conv operands as the kernel (isolates kernel correctness)
    ref_bf16 = _reference(x, conv_w, bn_gamma, bn_beta, stride=STRIDE,
                          conv_dtype=jnp.bfloat16)
    err_tight = float(jnp.max(jnp.abs(out - ref_bf16)))
    assert err_tight < 5e-3, err_tight

    # loose check: exact f32 PyTorch-semantics reference (difference = bf16 rounding only)
    ref_f32 = _reference(x, conv_w, bn_gamma, bn_beta, stride=STRIDE,
                         conv_dtype=jnp.float32)
    err_loose = float(jnp.max(jnp.abs(out - ref_f32)))
    assert err_loose < 1e-1, err_loose

    print("KERNEL_OK")
</pallas_src>

<mosaic_0001>
module attributes {stable_mosaic.version = 11 : i64} {
  func.func @_conv_stats_kernel(%arg0: i32, %arg1: memref<128x64xbf16, #tpu.memory_space<vmem>>, %arg2: memref<64x128xbf16, #tpu.memory_space<vmem>>, %arg3: memref<128x128xf32, #tpu.memory_space<vmem>>, %arg4: memref<1x128xf32, #tpu.memory_space<vmem>>, %arg5: memref<1x128xf32, #tpu.memory_space<vmem>>) attributes {dimension_semantics = [#tpu.dimension_semantics<arbitrary>], iteration_bounds = array<i64: 1>, scalar_prefetch = 0 : i64, scratch_operands = 0 : i64, tpu.core_type = #tpu.core_type<tc>, window_params = [{transform_indices = @transform_0, window_bounds = array<i64: 128, 64>}, {pipeline_mode = #tpu.pipeline_mode<synchronous>, transform_indices = @transform_1, window_bounds = array<i64: 64, 128>}, {transform_indices = @transform_2, window_bounds = array<i64: 128, 128>}, {pipeline_mode = #tpu.pipeline_mode<synchronous>, transform_indices = @transform_3, window_bounds = array<i64: 1, 128>}, {pipeline_mode = #tpu.pipeline_mode<synchronous>, transform_indices = @transform_4, window_bounds = array<i64: 1, 128>}]} {
    %c0_i32 = arith.constant 0 : i32
    %0 = arith.cmpi eq, %arg0, %c0_i32 : i32
    %1 = arith.extui %0 : i1 to i32
    %c0_i32_0 = arith.constant 0 : i32
    %2 = arith.cmpi ne, %1, %c0_i32_0 : i32
    scf.if %2 {
      %cst_16 = arith.constant 0.000000e+00 : f32
      %18 = vector.broadcast %cst_16 : f32 to vector<1x128xf32>
      %c0_17 = arith.constant 0 : index
      %c0_18 = arith.constant 0 : index
      %19 = vector.load %arg4[%c0_17, %c0_18] : memref<1x128xf32, #tpu.memory_space<vmem>>, vector<1x128xf32>
      tpu.vector_store %arg4[%c0_17, %c0_18], %18 {strides = array<i32>} : memref<1x128xf32, #tpu.memory_space<vmem>>, vector<1x128xf32>,
      %cst_19 = arith.constant 0.000000e+00 : f32
      %20 = vector.broadcast %cst_19 : f32 to vector<1x128xf32>
      %c0_20 = arith.constant 0 : index
      %c0_21 = arith.constant 0 : index
      %21 = vector.load %arg5[%c0_20, %c0_21] : memref<1x128xf32, #tpu.memory_space<vmem>>, vector<1x128xf32>
      tpu.vector_store %arg5[%c0_20, %c0_21], %20 {strides = array<i32>} : memref<1x128xf32, #tpu.memory_space<vmem>>, vector<1x128xf32>,
    } else {
    }
    %c0 = arith.constant 0 : index
    %c0_1 = arith.constant 0 : index
    %3 = vector.load %arg1[%c0, %c0_1] : memref<128x64xbf16, #tpu.memory_space<vmem>>, vector<128x64xbf16>
    %c0_2 = arith.constant 0 : index
    %c0_3 = arith.constant 0 : index
    %4 = vector.load %arg2[%c0_2, %c0_3] : memref<64x128xbf16, #tpu.memory_space<vmem>>, vector<64x128xbf16>
    %cst = arith.constant dense<0.000000e+00> : vector<128x128xf32>
    %5 = tpu.matmul %3, %4, %cst {dimension_numbers = #tpu.dot_dimension_numbers<[1], [0], [0], [1], [0, 0, 1, 1], [], []>} : vector<128x64xbf16>, vector<64x128xbf16>, vector<128x128xf32> -> vector<128x128xf32>
    %c0_4 = arith.constant 0 : index
    %c0_5 = arith.constant 0 : index
    %6 = vector.load %arg3[%c0_4, %c0_5] : memref<128x128xf32, #tpu.memory_space<vmem>>, vector<128x128xf32>
    tpu.vector_store %arg3[%c0_4, %c0_5], %5 {strides = array<i32>} : memref<128x128xf32, #tpu.memory_space<vmem>>, vector<128x128xf32>,
    %c0_6 = arith.constant 0 : index
    %c0_7 = arith.constant 0 : index
    %7 = vector.load %arg4[%c0_6, %c0_7] : memref<1x128xf32, #tpu.memory_space<vmem>>, vector<1x128xf32>
    %cst_8 = arith.constant dense<0.000000e+00> : vector<128xf32>
    %8 = vector.multi_reduction <add>, %5, %cst_8 [0] : vector<128x128xf32> to vector<128xf32>
    %9 = vector.shape_cast %8 : vector<128xf32> to vector<1x128xf32>
    %10 = arith.addf %7, %9 : vector<1x128xf32>
    %c0_9 = arith.constant 0 : index
    %c0_10 = arith.constant 0 : index
    %11 = vector.load %arg4[%c0_9, %c0_10] : memref<1x128xf32, #tpu.memory_space<vmem>>, vector<1x128xf32>
    tpu.vector_store %arg4[%c0_9, %c0_10], %10 {strides = array<i32>} : memref<1x128xf32, #tpu.memory_space<vmem>>, vector<1x128xf32>,
    %c0_11 = arith.constant 0 : index
    %c0_12 = arith.constant 0 : index
    %12 = vector.load %arg5[%c0_11, %c0_12] : memref<1x128xf32, #tpu.memory_space<vmem>>, vector<1x128xf32>
    %13 = arith.mulf %5, %5 : vector<128x128xf32>
    %cst_13 = arith.constant dense<0.000000e+00> : vector<128xf32>
    %14 = vector.multi_reduction <add>, %13, %cst_13 [0] : vector<128x128xf32> to vector<128xf32>
    %15 = vector.shape_cast %14 : vector<128xf32> to vector<1x128xf32>
    %16 = arith.addf %12, %15 : vector<1x128xf32>
    %c0_14 = arith.constant 0 : index
    %c0_15 = arith.constant 0 : index
    %17 = vector.load %arg5[%c0_14, %c0_15] : memref<1x128xf32, #tpu.memory_space<vmem>>, vector<1x128xf32>
    tpu.vector_store %arg5[%c0_14, %c0_15], %16 {strides = array<i32>} : memref<1x128xf32, #tpu.memory_space<vmem>>, vector<1x128xf32>,
    return
  }
  func.func @transform_0(%arg0: i32) -> (i32, i32) {
    %c0_i32 = arith.constant 0 : i32
    %c0_i32_0 = arith.constant 0 : i32
    return %arg0, %c0_i32 : i32, i32
  }
  func.func @transform_1(%arg0: i32) -> (i32, i32) {
    %c0_i32 = arith.constant 0 : i32
    %c0_i32_0 = arith.constant 0 : i32
    %c0_i32_1 = arith.constant 0 : i32
    return %c0_i32, %c0_i32_0 : i32, i32
  }
  func.func @transform_2(%arg0: i32) -> (i32, i32) {
    %c0_i32 = arith.constant 0 : i32
    %c0_i32_0 = arith.constant 0 : i32
    return %arg0, %c0_i32 : i32, i32
  }
  func.func @transform_3(%arg0: i32) -> (i32, i32) {
    %c0_i32 = arith.constant 0 : i32
    %c0_i32_0 = arith.constant 0 : i32
    %c0_i32_1 = arith.constant 0 : i32
    return %c0_i32, %c0_i32_0 : i32, i32
  }
  func.func @transform_4(%arg0: i32) -> (i32, i32) {
    %c0_i32 = arith.constant 0 : i32
    %c0_i32_0 = arith.constant 0 : i32
    %c0_i32_1 = arith.constant 0 : i32
    return %c0_i32, %c0_i32_0 : i32, i32
  }
}

module attributes {stable_mosaic.version = 11 : i64} {
  func.func @_bn_act_kernel(%arg0: i32, %arg1: memref<128x128xf32, #tpu.memory_space<vmem>>, %arg2: memref<1x128xf32, #tpu.memory_space<vmem>>, %arg3: memref<1x128xf32, #tpu.memory_space<vmem>>, %arg4: memref<128x128xf32, #tpu.memory_space<vmem>>) attributes {dimension_semantics = [#tpu.dimension_semantics<parallel>], iteration_bounds = array<i64: 1>, scalar_prefetch = 0 : i64, scratch_operands = 0 : i64, tpu.core_type = #tpu.core_type<tc>, window_params = [{transform_indices = @transform_0, window_bounds = array<i64: 128, 128>}, {pipeline_mode = #tpu.pipeline_mode<synchronous>, transform_indices = @transform_1, window_bounds = array<i64: 1, 128>}, {pipeline_mode = #tpu.pipeline_mode<synchronous>, transform_indices = @transform_2, window_bounds = array<i64: 1, 128>}, {transform_indices = @transform_3, window_bounds = array<i64: 128, 128>}]} {
    %c0 = arith.constant 0 : index
    %c0_0 = arith.constant 0 : index
    %0 = vector.load %arg1[%c0, %c0_0] : memref<128x128xf32, #tpu.memory_space<vmem>>, vector<128x128xf32>
    %c0_1 = arith.constant 0 : index
    %c0_2 = arith.constant 0 : index
    %1 = vector.load %arg2[%c0_1, %c0_2] : memref<1x128xf32, #tpu.memory_space<vmem>>, vector<1x128xf32>
    %2 = vector.broadcast %1 : vector<1x128xf32> to vector<128x128xf32>
    %3 = arith.mulf %0, %2 : vector<128x128xf32>
    %c0_3 = arith.constant 0 : index
    %c0_4 = arith.constant 0 : index
    %4 = vector.load %arg3[%c0_3, %c0_4] : memref<1x128xf32, #tpu.memory_space<vmem>>, vector<1x128xf32>
    %5 = vector.broadcast %4 : vector<1x128xf32> to vector<128x128xf32>
    %6 = arith.addf %3, %5 : vector<128x128xf32>
    %cst = arith.constant 0.000000e+00 : f32
    %7 = vector.broadcast %cst : f32 to vector<128x128xf32>
    %8 = arith.cmpf oge, %6, %7 : vector<128x128xf32>
    %cst_5 = arith.constant 2.000000e-01 : f32
    %9 = vector.broadcast %cst_5 : f32 to vector<128x128xf32>
    %10 = arith.mulf %9, %6 : vector<128x128xf32>
    %11 = arith.select %8, %6, %10 : vector<128x128xi1>, vector<128x128xf32>
    %c0_6 = arith.constant 0 : index
    %c0_7 = arith.constant 0 : index
    %12 = vector.load %arg4[%c0_6, %c0_7] : memref<128x128xf32, #tpu.memory_space<vmem>>, vector<128x128xf32>
    tpu.vector_store %arg4[%c0_6, %c0_7], %11 {strides = array<i32>} : memref<128x128xf32, #tpu.memory_space<vmem>>, vector<128x128xf32>,
    return
  }
  func.func @transform_0(%arg0: i32) -> (i32, i32) {
    %c0_i32 = arith.constant 0 : i32
    %c0_i32_0 = arith.constant 0 : i32
    return %arg0, %c0_i32 : i32, i32
  }
  func.func @transform_1(%arg0: i32) -> (i32, i32) {
    %c0_i32 = arith.constant 0 : i32
    %c0_i32_0 = arith.constant 0 : i32
    %c0_i32_1 = arith.constant 0 : i32
    return %c0_i32, %c0_i32_0 : i32, i32
  }
  func.func @transform_2(%arg0: i32) -> (i32, i32) {
    %c0_i32 = arith.constant 0 : i32
    %c0_i32_0 = arith.constant 0 : i32
    %c0_i32_1 = arith.constant 0 : i32
    return %c0_i32, %c0_i32_0 : i32, i32
  }
  func.func @transform_3(%arg0: i32) -> (i32, i32) {
    %c0_i32 = arith.constant 0 : i32
    %c0_i32_0 = arith.constant 0 : i32
    return %arg0, %c0_i32 : i32, i32
  }
}

</mosaic_0001>

<bundles_post_ra>
// kernel: disblock_forward.2
= control target key start
LH: loop header
LB: loop body
LE: loop exit
PB: predicated region body
PF: predicated region fallthrough
CT: control target
= control target key end

     0   :  { %vm109_vm0 = vcmask 523264   ;;  %v356_v23 = vmov 0.0   ;;  %s498_s1 = inlined_call_operand.vmem [shape: bf16[64,128], index: 1, kind: input, shape index: {}]   ;;  %s499_s0 = inlined_call_operand.vmem [shape: bf16[128,64], index: 0, kind: input, shape index: {}]   ;;  %s500_s2 = inlined_call_operand.vmem [shape: f32[128,128], index: 2, kind: output, shape index: {0}]   ;;  %s501_s3 = inlined_call_operand.vmem [shape: f32[1,128], index: 3, kind: output, shape index: {1}]   ;;  %s502_s4 = inlined_call_operand.vmem [shape: f32[1,128], index: 4, kind: output, shape index: {2}]  }
   0x1   :  { %v342_v0 = vld [vmem:[%s498_s1 + $0x18] sm:$0xff]  ;;  %v341_v1 = vld [vmem:[%s498_s1 + $0x10] sm:$0xff]  ;;  %v340_v2 = vld [vmem:[%s498_s1 + $0x8] sm:$0xff]  ;;  %19 = vst [vmem:[%s501_s3] sm:$0x1] %v356_v23 }
   0x2   :  { %138 = vmatpush.bf16.msra.mxu0 %v342_v0  ;;  %343 = vmatpush.bf16.msra.mxu1 %v342_v0  ;;  %v339_v3 = vld [vmem:[%s498_s1] sm:$0xff]  ;;  %v333_v5 = vld [vmem:[%s499_s0 + $0x10] sm:$0xff]  ;;  %v332_v8 = vld [vmem:[%s499_s0 + $0x8] sm:$0xff]  ;;  %20 = vst [vmem:[%s502_s4] sm:$0x1] %v356_v23 }
   0x3   :  { %344 = vmatpush.bf16.msra.mxu2 %v342_v0  ;;  %345 = vmatpush.bf16.msra.mxu3 %v342_v0  ;;  %v331_v4 = vld [vmem:[%s499_s0] sm:$0xff]  ;;  %v337_v7 = vld [vmem:[%s499_s0 + $0x30] sm:$0xff]  ;;  %v334_v9 = vld [vmem:[%s499_s0 + $0x18] sm:$0xff] }
   0x4   :  { %v335_v6 = vld [vmem:[%s499_s0 + $0x20] sm:$0xff]  ;;  %v336_v10 = vld [vmem:[%s499_s0 + $0x28] sm:$0xff]  ;;  %v338_v11 = vld [vmem:[%s499_s0 + $0x38] sm:$0xff] }
   0x6   :  { %139 = vmatpush.bf16.msra.mxu0 %v341_v1  ;;  %346 = vmatpush.bf16.msra.mxu1 %v341_v1 }
   0x7   :  { %347 = vmatpush.bf16.msra.mxu2 %v341_v1  ;;  %348 = vmatpush.bf16.msra.mxu3 %v341_v1 }
   0x9   :  { %v223_v23 = vld [vmem:[%s502_s4] sm:$0x1] }
   0xa   :  { %140 = vmatpush.bf16.msra.mxu0 %v340_v2  ;;  %349 = vmatpush.bf16.msra.mxu1 %v340_v2 }
   0xb   :  { %350 = vmatpush.bf16.msra.mxu2 %v340_v2  ;;  %351 = vmatpush.bf16.msra.mxu3 %v340_v2 }
   0xe   :  { %141 = vmatpush.bf16.msra.mxu0 %v339_v3  ;;  %352 = vmatpush.bf16.msra.mxu1 %v339_v3 }
   0xf   :  { %353 = vmatpush.bf16.msra.mxu2 %v339_v3  ;;  %354 = vmatpush.bf16.msra.mxu3 %v339_v3 }
  0x11   :  { %323 = vmatmul.msk.bf16.vlgmr.msra.gmra.mxu0 %vm109_vm0, %v331_v4  ;;  %325 = vmatmul.msk.bf16.vlgmr.msra.gmra.mxu1 %vm109_vm0, %v333_v5 }
  0x12   :  { %327 = vmatmul.msk.bf16.vlgmr.msra.gmra.mxu2 %vm109_vm0, %v335_v6  ;;  %329 = vmatmul.msk.bf16.vlgmr.msra.gmra.mxu3 %vm109_vm0, %v337_v7 }
  0x21   :  { %324 = vmatmul.msk.bf16.gmra.mxu0 %vm109_vm0, %v332_v8  ;;  %326 = vmatmul.msk.bf16.gmra.mxu1 %vm109_vm0, %v334_v9 }
  0x22   :  { %328 = vmatmul.msk.bf16.gmra.mxu2 %vm109_vm0, %v336_v10  ;;  %330 = vmatmul.msk.bf16.gmra.mxu3 %vm109_vm0, %v338_v11 }
  0x8e   :  { %v143_v12 = vpop.f32.mrf.mxu0  ;;  %v153_v13 = vpop.f32.mrf.mxu1 }
  0x8f   :  { %183 = vst [vmem:[%s500_s2] sm:$0xff] %v143_v12  ;;  %v224_v24 = vmul.f32 %v143_v12, %v143_v12  ;;  %v228_v36 = vmul.f32 %v153_v13, %v153_v13 }
  0x90   :  { %187 = vst [vmem:[%s500_s2 + $0x20] sm:$0xff] %v153_v13 }
  0x95   :  { %v163_v14 = vpop.f32.mrf.mxu2  ;;  %v432_v15 = vpop.f32.mrf.mxu3 }
  0x96   :  { %v145_v16 = vpop.f32.mrf.mxu0  ;;  %v155_v17 = vpop.f32.mrf.mxu1  ;;  %191 = vst [vmem:[%s500_s2 + $0x40] sm:$0xff] %v163_v14  ;;  %v232_v50 = vmul.f32 %v163_v14, %v163_v14  ;;  %v236_v62 = vmul.f32 %v432_v15, %v432_v15 }
  0x97   :  { %184 = vst [vmem:[%s500_s2 + $0x8] sm:$0xff] %v145_v16  ;;  %v225_v22 = vmul.f32 %v145_v16, %v145_v16  ;;  %v200_v25 = vadd.f32 %v145_v16, %v143_v12  ;;  %v229_v39 = vmul.f32 %v155_v17, %v155_v17 }
  0x98   :  { %188 = vst [vmem:[%s500_s2 + $0x28] sm:$0xff] %v155_v17 }
  0x99   :  { %195 = vst [vmem:[%s500_s2 + $0x60] sm:$0xff] %v432_v15  ;;  %v240_v27 = vadd.f32 %v225_v22, %v224_v24 }
  0x9d   :  { %v165_v18 = vpop.f32.mrf.mxu2  ;;  %v175_v19 = vpop.f32.mrf.mxu3 }
  0x9e   :  { %v148_v20 = vpop.f32.mrf.mxu0  ;;  %v158_v21 = vpop.f32.mrf.mxu1  ;;  %192 = vst [vmem:[%s500_s2 + $0x48] sm:$0xff] %v165_v18  ;;  %v233_v53 = vmul.f32 %v165_v18, %v165_v18  ;;  %v237_v1 = vmul.f32 %v175_v19, %v175_v19 }
  0x9f   :  { %185 = vst [vmem:[%s500_s2 + $0x10] sm:$0xff] %v148_v20  ;;  %v226_v26 = vmul.f32 %v148_v20, %v148_v20  ;;  %v201_v28 = vadd.f32 %v200_v25, %v148_v20  ;;  %v230_v42 = vmul.f32 %v158_v21, %v158_v21 }
  0xa0   :  { %189 = vst [vmem:[%s500_s2 + $0x30] sm:$0xff] %v158_v21 }
  0xa1   :  { %196 = vst [vmem:[%s500_s2 + $0x68] sm:$0xff] %v175_v19  ;;  %v241_v33 = vadd.f32 %v240_v27, %v226_v26 }
  0xa5   :  { %v168_v29 = vpop.f32.mrf.mxu2  ;;  %v178_v30 = vpop.f32.mrf.mxu3 }
  0xa6   :  { %v150_v31 = vpop.f32.mrf.mxu0  ;;  %v160_v32 = vpop.f32.mrf.mxu1  ;;  %193 = vst [vmem:[%s500_s2 + $0x50] sm:$0xff] %v168_v29  ;;  %v234_v57 = vmul.f32 %v168_v29, %v168_v29  ;;  %v238_v5 = vmul.f32 %v178_v30, %v178_v30 }
  0xa7   :  { %186 = vst [vmem:[%s500_s2 + $0x18] sm:$0xff] %v150_v31  ;;  %v202_v34 = vadd.f32 %v201_v28, %v150_v31  ;;  %v227_v35 = vmul.f32 %v150_v31, %v150_v31  ;;  %v231_v48 = vmul.f32 %v160_v32, %v160_v32 }
  0xa8   :  { %190 = vst [vmem:[%s500_s2 + $0x38] sm:$0xff] %v160_v32 }
  0xa9   :  { %v203_v37 = vadd.f32 %v202_v34, %v153_v13  ;;  %v242_v38 = vadd.f32 %v241_v33, %v227_v35  ;;  %197 = vst [vmem:[%s500_s2 + $0x70] sm:$0xff] %v178_v30 }
  0xab   :  { %v243_v40 = vadd.f32 %v242_v38, %v228_v36  ;;  %v204_v41 = vadd.f32 %v203_v37, %v155_v17 }
  0xad   :  { %v205_v43 = vadd.f32 %v204_v41, %v158_v21  ;;  %v244_v44 = vadd.f32 %v243_v40, %v229_v39  ;;  %v170_v45 = vpop.f32.mrf.mxu2  ;;  %v180_v46 = vpop.f32.mrf.mxu3 }
  0xae   :  { %194 = vst [vmem:[%s500_s2 + $0x58] sm:$0xff] %v170_v45  ;;  %v235_v61 = vmul.f32 %v170_v45, %v170_v45  ;;  %v239_v9 = vmul.f32 %v180_v46, %v180_v46 }
  0xaf   :  { %v206_v47 = vadd.f32 %v205_v43, %v160_v32  ;;  %v245_v49 = vadd.f32 %v244_v44, %v230_v42  ;;  %198 = vst [vmem:[%s500_s2 + $0x78] sm:$0xff] %v180_v46 }
  0xb1   :  { %v207_v51 = vadd.f32 %v206_v47, %v163_v14  ;;  %v246_v52 = vadd.f32 %v245_v49, %v231_v48 }
  0xb3   :  { %v247_v54 = vadd.f32 %v246_v52, %v232_v50  ;;  %v208_v55 = vadd.f32 %v207_v51, %v165_v18 }
  0xb5   :  { %v209_v56 = vadd.f32 %v208_v55, %v168_v29  ;;  %v248_v58 = vadd.f32 %v247_v54, %v233_v53 }
  0xb7   :  { %v249_v59 = vadd.f32 %v248_v58, %v234_v57  ;;  %v210_v60 = vadd.f32 %v209_v56, %v170_v45 }
  0xb9   :  { %v211_v63 = vadd.f32 %v210_v60, %v432_v15  ;;  %v250_v0 = vadd.f32 %v249_v59, %v235_v61 }
  0xbb   :  { %v251_v2 = vadd.f32 %v250_v0, %v236_v62  ;;  %v212_v3 = vadd.f32 %v211_v63, %v175_v19  ;;  %v199_v19 = vld [vmem:[%s501_s3] sm:$0x1] }
  0xbd   :  { %v213_v4 = vadd.f32 %v212_v3, %v178_v30  ;;  %v252_v6 = vadd.f32 %v251_v2, %v237_v1 }
  0xbf   :  { %v253_v7 = vadd.f32 %v252_v6, %v238_v5  ;;  %v214_v8 = vadd.f32 %v213_v4, %v180_v46 }
  0xc1   :  { %v215_v10 = vrot.slane %v214_v8, 4  ;;  %v254_v11 = vadd.f32 %v253_v7, %v239_v9 }
  0xc3   :  { %v216_v12 = vadd.f32 %v215_v10, %v214_v8  ;;  %v255_v13 = vrot.slane %v254_v11, 4 }
  0xc5   :  { %v217_v14 = vrot.slane %v216_v12, 2  ;;  %v256_v16 = vadd.f32 %v255_v13, %v254_v11 }
  0xc7   :  { %v218_v17 = vadd.f32 %v217_v14, %v216_v12  ;;  %v257_v18 = vrot.slane %v256_v16, 2 }
  0xc9   :  { %v219_v20 = vrot.slane %v218_v17, 1  ;;  %v258_v15 = vadd.f32 %v257_v18, %v256_v16 }
  0xcb   :  { %v220_v21 = vadd.f32 %v219_v20, %v218_v17  ;;  %v259_v22 = vrot.slane %v258_v15, 1 }
  0xcd   :  { %v221_v24 = vadd.f32 %v220_v21, %v199_v19  ;;  %v260_v25 = vadd.f32 %v259_v22, %v258_v15 }
  0xcf   :  { %222 = vst [vmem:[%s501_s3] sm:$0x1] %v221_v24  ;;  %v261_v26 = vadd.f32 %v260_v25, %v223_v23 }
  0xd1   :  { %262 = vst [vmem:[%s502_s4] sm:$0x1] %v261_v26 }

// kernel: disblock_forward.3
= control target key start
LH: loop header
LB: loop body
LE: loop exit
PB: predicated region body
PF: predicated region fallthrough
CT: control target
= control target key end

     0   :  { %s298_s0 = inlined_call_operand.vmem [shape: f32[128,128], index: 0, kind: input, shape index: {}, may-alias: {0,3}]   ;;  %s299_s1 = inlined_call_operand.vmem [shape: f32[1,128], index: 1, kind: input, shape index: {}]   ;;  %s300_s2 = inlined_call_operand.vmem [shape: f32[1,128], index: 2, kind: input, shape index: {}]   ;;  %s301_s3 = inlined_call_operand.vmem [shape: f32[128,128], index: 3, kind: output, shape index: {}, may-alias: {0,3}]  }
   0x1   :  { %v14_v0 = vld [vmem:[%s298_s0] sm:$0xff]  ;;  %v15_v3 = vld [vmem:[%s298_s0 + $0x8] sm:$0xff]  ;;  %v16_v6 = vld [vmem:[%s298_s0 + $0x10] sm:$0xff] }
   0x2   :  { %v166_v1 = vld [vmem:[%s299_s1] ss:$0 sm:$0xff]  ;;  %v17_v7 = vld [vmem:[%s298_s0 + $0x18] sm:$0xff]  ;;  %v19_v12 = vld [vmem:[%s298_s0 + $0x28] sm:$0xff] }
   0x3   :  { %v171_v2 = vld [vmem:[%s300_s2] ss:$0 sm:$0xff]  ;;  %v34_v4 = vmul.f32 %v166_v1, %v14_v0  ;;  %v35_v5 = vmul.f32 %v166_v1, %v15_v3  ;;  %v36_v9 = vmul.f32 %v166_v1, %v16_v6  ;;  %v37_v10 = vmul.f32 %v166_v1, %v17_v7  ;;  %v20_v13 = vld [vmem:[%s298_s0 + $0x30] sm:$0xff]  ;;  %v21_v14 = vld [vmem:[%s298_s0 + $0x38] sm:$0xff] }
   0x4   :  { %v18_v8 = vld [vmem:[%s298_s0 + $0x20] sm:$0xff]  ;;  %v39_v17 = vmul.f32 %v166_v1, %v19_v12  ;;  %v40_v18 = vmul.f32 %v166_v1, %v20_v13  ;;  %v41_v22 = vmul.f32 %v166_v1, %v21_v14  ;;  %v23_v24 = vld [vmem:[%s298_s0 + $0x48] sm:$0xff]  ;;  %v24_v32 = vld [vmem:[%s298_s0 + $0x50] sm:$0xff] }
   0x5   :  { %v38_v11 = vmul.f32 %v166_v1, %v18_v8  ;;  %v54_v15 = vadd.f32 %v171_v2, %v34_v4  ;;  %v55_v16 = vadd.f32 %v171_v2, %v35_v5  ;;  %v56_v19 = vadd.f32 %v171_v2, %v36_v9  ;;  %v22_v23 = vld [vmem:[%s298_s0 + $0x40] sm:$0xff] }
   0x6   :  { %v57_v20 = vadd.f32 %v171_v2, %v37_v10  ;;  %v59_v35 = vadd.f32 %v171_v2, %v39_v17  ;;  %v60_v36 = vadd.f32 %v171_v2, %v40_v18  ;;  %v61_v38 = vadd.f32 %v171_v2, %v41_v22 }
   0x7   :  { %v58_v21 = vadd.f32 %v171_v2, %v38_v11  ;;  %vm70_vm0 = vcmp.ge.f32.partialorder %v54_v15, 0.0  ;;  %v86_v25 = vmul.f32 0.2, %v54_v15  ;;  %vm71_vm1 = vcmp.ge.f32.partialorder %v55_v16, 0.0 }
   0x8   :  { %v87_v26 = vmul.f32 0.2, %v55_v16  ;;  %vm72_vm2 = vcmp.ge.f32.partialorder %v56_v19, 0.0  ;;  %v88_v27 = vmul.f32 0.2, %v56_v19  ;;  %vm73_vm3 = vcmp.ge.f32.partialorder %v57_v20, 0.0 }
   0x9   :  { %v89_v28 = vmul.f32 0.2, %v57_v20  ;;  %v102_v29 = vsel %vm70_vm0, %v54_v15, %v86_v25  ;;  %vm74_vm4 = vcmp.ge.f32.partialorder %v58_v21, 0.0  ;;  %v90_v31 = vmul.f32 0.2, %v58_v21 }
   0xa   :  { %v103_v30 = vsel %vm71_vm1, %v55_v16, %v87_v26  ;;  %118 = vst [vmem:[%s301_s3] sm:$0xff] %v102_v29  ;;  %v104_v33 = vsel %vm72_vm2, %v56_v19, %v88_v27  ;;  %v42_v39 = vmul.f32 %v166_v1, %v22_v23  ;;  %v43_v40 = vmul.f32 %v166_v1, %v23_v24 }
   0xb   :  { %v105_v34 = vsel %vm73_vm3, %v57_v20, %v89_v28  ;;  %119 = vst [vmem:[%s301_s3 + $0x8] sm:$0xff] %v103_v30  ;;  %v106_v37 = vsel %vm74_vm4, %v58_v21, %v90_v31  ;;  %vm75_vm5 = vcmp.ge.f32.partialorder %v59_v35, 0.0  ;;  %v91_v42 = vmul.f32 0.2, %v59_v35 }
   0xc   :  { %vm76_vm6 = vcmp.ge.f32.partialorder %v60_v36, 0.0  ;;  %v44_v43 = vmul.f32 %v166_v1, %v24_v32  ;;  %v92_v44 = vmul.f32 0.2, %v60_v36  ;;  %vm77_vm7 = vcmp.ge.f32.partialorder %v61_v38, 0.0 }
   0xd   :  { %v93_v45 = vmul.f32 0.2, %v61_v38  ;;  %v62_v46 = vadd.f32 %v171_v2, %v42_v39  ;;  %v107_v47 = vsel %vm75_vm5, %v59_v35, %v91_v42  ;;  %v63_v48 = vadd.f32 %v171_v2, %v43_v40 }
   0xe   :  { %v64_v49 = vadd.f32 %v171_v2, %v44_v43  ;;  %v108_v53 = vsel %vm76_vm6, %v60_v36, %v92_v44 }
   0xf   :  { %v109_v54 = vsel %vm77_vm7, %v61_v38, %v93_v45  ;;  %vm78_vm8 = vcmp.ge.f32.partialorder %v62_v46, 0.0  ;;  %v94_v55 = vmul.f32 0.2, %v62_v46  ;;  %vm79_vm9 = vcmp.ge.f32.partialorder %v63_v48, 0.0 }
  0x10   :  { %v95_v57 = vmul.f32 0.2, %v63_v48  ;;  %vm80_vm10 = vcmp.ge.f32.partialorder %v64_v49, 0.0  ;;  %v96_v61 = vmul.f32 0.2, %v64_v49 }
  0x11   :  { %v110_v60 = vsel %vm78_vm8, %v62_v46, %v94_v55 }
  0x12   :  { %v25_v41 = vld [vmem:[%s298_s0 + $0x58] sm:$0xff]  ;;  %v111_v0 = vsel %vm79_vm9, %v63_v48, %v95_v57  ;;  %v112_v5 = vsel %vm80_vm10, %v64_v49, %v96_v61 }
  0x13   :  { %120 = vst [vmem:[%s301_s3 + $0x10] sm:$0xff] %v104_v33  ;;  %v45_v50 = vmul.f32 %v166_v1, %v25_v41 }
  0x14   :  { %121 = vst [vmem:[%s301_s3 + $0x18] sm:$0xff] %v105_v34 }
  0x15   :  { %122 = vst [vmem:[%s301_s3 + $0x20] sm:$0xff] %v106_v37  ;;  %v65_v58 = vadd.f32 %v171_v2, %v45_v50 }
  0x17   :  { %vm81_vm11 = vcmp.ge.f32.partialorder %v65_v58, 0.0  ;;  %v97_v3 = vmul.f32 0.2, %v65_v58 }
  0x19   :  { %v113_v9 = vsel %vm81_vm11, %v65_v58, %v97_v3 }
  0x1c   :  { %v26_v51 = vld [vmem:[%s298_s0 + $0x60] sm:$0xff]  ;;  %v27_v52 = vld [vmem:[%s298_s0 + $0x68] sm:$0xff] }
  0x1d   :  { %123 = vst [vmem:[%s301_s3 + $0x28] sm:$0xff] %v107_v47  ;;  %v46_v62 = vmul.f32 %v166_v1, %v26_v51  ;;  %v47_v63 = vmul.f32 %v166_v1, %v27_v52 }
  0x1f   :  { %v66_v6 = vadd.f32 %v171_v2, %v46_v62  ;;  %v67_v7 = vadd.f32 %v171_v2, %v47_v63 }
  0x21   :  { %vm82_vm12 = vcmp.ge.f32.partialorder %v66_v6, 0.0  ;;  %v98_v11 = vmul.f32 0.2, %v66_v6  ;;  %vm83_vm13 = vcmp.ge.f32.partialorder %v67_v7, 0.0  ;;  %v99_v13 = vmul.f32 0.2, %v67_v7 }
  0x23   :  { %v115_v16 = vsel %vm83_vm13, %v67_v7, %v99_v13 }
  0x24   :  { %v28_v56 = vld [vmem:[%s298_s0 + $0x70] sm:$0xff] }
  0x25   :  { %124 = vst [vmem:[%s301_s3 + $0x30] sm:$0xff] %v108_v53  ;;  %v48_v4 = vmul.f32 %v166_v1, %v28_v56 }
  0x27   :  { %v68_v10 = vadd.f32 %v171_v2, %v48_v4 }
  0x29   :  { %vm84_vm14 = vcmp.ge.f32.partialorder %v68_v10, 0.0  ;;  %v100_v14 = vmul.f32 0.2, %v68_v10 }
  0x2b   :  { %v116_v17 = vsel %vm84_vm14, %v68_v10, %v100_v14 }
  0x2c   :  { %v29_v59 = vld [vmem:[%s298_s0 + $0x78] sm:$0xff] }
  0x2d   :  { %125 = vst [vmem:[%s301_s3 + $0x38] sm:$0xff] %v109_v54  ;;  %v49_v8 = vmul.f32 %v166_v1, %v29_v59  ;;  %v114_v1 = vsel %vm82_vm12, %v66_v6, %v98_v11 }
  0x2e   :  { %126 = vst [vmem:[%s301_s3 + $0x40] sm:$0xff] %v110_v60 }
  0x2f   :  { %127 = vst [vmem:[%s301_s3 + $0x48] sm:$0xff] %v111_v0  ;;  %v69_v12 = vadd.f32 %v171_v2, %v49_v8 }
  0x30   :  { %128 = vst [vmem:[%s301_s3 + $0x50] sm:$0xff] %v112_v5 }
  0x31   :  { %129 = vst [vmem:[%s301_s3 + $0x58] sm:$0xff] %v113_v9  ;;  %vm85_vm15 = vcmp.ge.f32.partialorder %v69_v12, 0.0  ;;  %v101_v15 = vmul.f32 0.2, %v69_v12 }
  0x32   :  { %130 = vst [vmem:[%s301_s3 + $0x60] sm:$0xff] %v114_v1 }
  0x33   :  { %131 = vst [vmem:[%s301_s3 + $0x68] sm:$0xff] %v115_v16  ;;  %v117_v18 = vsel %vm85_vm15, %v69_v12, %v101_v15 }
  0x34   :  { %132 = vst [vmem:[%s301_s3 + $0x70] sm:$0xff] %v116_v17 }
  0x35   :  { %133 = vst [vmem:[%s301_s3 + $0x78] sm:$0xff] %v117_v18 }

</bundles_post_ra>
